<compile_context>
chip_gen: v7x
topology: tpu7x:2x2x1
jax: 0.10.0
libtpu: 0.0.40
codegen_flags: <defaults>
</compile_context>

<pallas_src>
import functools

import jax
import jax.numpy as jnp
from jax.experimental import pallas as pl
from jax.experimental.pallas import tpu as pltpu


def _round_up(x, m):
    return (x + m - 1) // m * m


# ---------------------------------------------------------------------------
# Kernel 1: fused direct convolution (stride 1) + bias + InstanceNorm + ReLU /
#           residual-add / tanh epilogue.
#
# For a stride-1 conv on the spatially padded input (Hp, Wp, Cin), flat output
# position q = u*Wp + v satisfies
#     out[q] = sum_{i,j} x_flat[q + i*Wp + j] @ w[i, j]
# so every tap is a plain contiguous 2-D slice of the flat input and one 2-D
# MXU matmul -- no im2col copy is materialized.  Flat positions with v >= Wo
# wrap into the next row (garbage); they are excluded from the InstanceNorm
# statistics with a precomputed {0,1} mask and sliced off by the wrapper.
# ---------------------------------------------------------------------------
def _conv_flat_kernel(*refs, taps, count, norm, relu, tanh_act, has_res,
                      eps=1e-5):
    x_ref, w_ref, b_ref = refs[0], refs[1], refs[2]
    idx = 3
    m_ref = r_ref = None
    if norm:
        m_ref = refs[idx]
        idx += 1
    if has_res:
        r_ref = refs[idx]
        idx += 1
    o_ref = refs[idx]

    L, ct = o_ref.shape
    # Bias folded into the accumulator init; f32 accumulation of bf16 MXU dots.
    acc = jnp.broadcast_to(b_ref[...], (L, ct)).astype(jnp.float32)
    for t, off in enumerate(taps):
        xs = x_ref[pl.ds(off, L), :].astype(jnp.bfloat16)
        acc = acc + jnp.dot(xs, w_ref[t], preferred_element_type=jnp.float32)

    if norm:
        mask = m_ref[...]                       # (L, 1) valid-column mask
        inv_n = 1.0 / count
        mean = jnp.sum(acc * mask, axis=0, keepdims=True) * inv_n
        diff = (acc - mean) * mask
        var = jnp.sum(diff * diff, axis=0, keepdims=True) * inv_n
        acc = (acc - mean) * jax.lax.rsqrt(var + eps)
    if has_res:
        acc = acc + r_ref[...]
    if relu:
        acc = jnp.maximum(acc, 0.0)
    if tanh_act:
        acc = jnp.tanh(acc)
    o_ref[...] = acc


def _conv_flat(xp, w, b, *, norm, relu, tanh_act, residual):
    """xp: (N, Hp, Wp, Cin) already spatially padded; w: (kh, kw, Cin, Cout)."""
    N, Hp, Wp, Cin = xp.shape
    kh, kw, _, Cout = w.shape
    Ho, Wo = Hp - kh + 1, Wp - kw + 1
    L = Ho * Wp                      # flat output rows (incl. kw-1 junk cols/row)
    Lx = Hp * Wp + (kw - 1)
    ct = 128 if Cout % 128 == 0 else Cout

    xf = xp.reshape(N, Hp * Wp, Cin)
    if kw > 1:
        xf = jnp.pad(xf, ((0, 0), (0, kw - 1), (0, 0)))
    wf = w.reshape(kh * kw, Cin, Cout).astype(jnp.bfloat16)
    bf = b.astype(jnp.float32).reshape(1, Cout)
    taps = tuple(i * Wp + j for i in range(kh) for j in range(kw))

    inputs = [xf, wf, bf]
    in_specs = [
        pl.BlockSpec((None, Lx, Cin), lambda n, c: (n, 0, 0)),
        pl.BlockSpec((kh * kw, Cin, ct), lambda n, c: (0, 0, c)),
        pl.BlockSpec((1, ct), lambda n, c: (0, c)),
    ]
    if norm:
        col = jnp.arange(L, dtype=jnp.int32) % Wp
        mask = (col < Wo).astype(jnp.float32).reshape(L, 1)
        inputs.append(mask)
        in_specs.append(pl.BlockSpec((L, 1), lambda n, c: (0, 0)))
    if residual is not None:
        rf = jnp.pad(residual, ((0, 0), (0, 0), (0, Wp - Wo), (0, 0)))
        inputs.append(rf.reshape(N, L, Cout))
        in_specs.append(pl.BlockSpec((None, L, ct), lambda n, c: (n, 0, c)))

    kernel = functools.partial(
        _conv_flat_kernel, taps=taps, count=Ho * Wo, norm=norm, relu=relu,
        tanh_act=tanh_act, has_res=residual is not None)
    out = pl.pallas_call(
        kernel,
        out_shape=jax.ShapeDtypeStruct((N, L, Cout), jnp.float32),
        grid=(N, Cout // ct),
        in_specs=in_specs,
        out_specs=pl.BlockSpec((None, L, ct), lambda n, c: (n, 0, c)),
        compiler_params=pltpu.CompilerParams(
            dimension_semantics=("parallel", "parallel")),
    )(*inputs)
    return out.reshape(N, Ho, Wp, Cout)[:, :, :Wo, :]


# ---------------------------------------------------------------------------
# Kernel 2: tiled MXU matmul + bias (used for the strided down-sampling convs
# via im2col, or as an oversized-shape fallback).
# ---------------------------------------------------------------------------
def _matmul_bias_kernel(a_ref, b_ref, bias_ref, o_ref, acc_ref):
    @pl.when(pl.program_id(2) == 0)
    def _():
        acc_ref[...] = jnp.broadcast_to(bias_ref[...], acc_ref.shape)

    acc_ref[...] += jnp.dot(a_ref[...], b_ref[...],
                            preferred_element_type=jnp.float32)

    @pl.when(pl.program_id(2) == pl.num_programs(2) - 1)
    def _():
        o_ref[...] = acc_ref[...]


def _pallas_matmul_bias(a, b, bias):
    """a: (M, K) @ b: (K, N) + bias: (N,) -> (M, N) f32 (bf16 MXU operands)."""
    M, K = a.shape
    N = b.shape[1]
    tm = min(256, _round_up(M, 8))
    tn = min(256, _round_up(N, 128))
    kp0 = _round_up(K, 128)
    tk = kp0 if kp0 <= 2048 else 512
    Mp, Np, Kp = _round_up(M, tm), _round_up(N, tn), _round_up(K, tk)
    a_p = jnp.pad(a, ((0, Mp - M), (0, Kp - K))).astype(jnp.bfloat16)
    b_p = jnp.pad(b, ((0, Kp - K), (0, Np - N))).astype(jnp.bfloat16)
    bias_p = jnp.pad(bias.astype(jnp.float32).reshape(1, N),
                     ((0, 0), (0, Np - N)))
    out = pl.pallas_call(
        _matmul_bias_kernel,
        out_shape=jax.ShapeDtypeStruct((Mp, Np), jnp.float32),
        grid=(Mp // tm, Np // tn, Kp // tk),
        in_specs=[
            pl.BlockSpec((tm, tk), lambda i, j, k: (i, k)),
            pl.BlockSpec((tk, tn), lambda i, j, k: (k, j)),
            pl.BlockSpec((1, tn), lambda i, j, k: (0, j)),
        ],
        out_specs=pl.BlockSpec((tm, tn), lambda i, j, k: (i, j)),
        scratch_shapes=[pltpu.VMEM((tm, tn), jnp.float32)],
        compiler_params=pltpu.CompilerParams(
            dimension_semantics=("parallel", "parallel", "arbitrary")),
    )(a_p, b_p, bias_p)
    return out[:M, :N]


# ---------------------------------------------------------------------------
# Kernel 3: standalone InstanceNorm(+ReLU, +residual) on NHWC activations with
# C kept lane-minor.  Grid = (batch, channel tiles).
# ---------------------------------------------------------------------------
def _in_act_kernel(*refs, relu, has_res, eps=1e-5):
    if has_res:
        x_ref, r_ref, o_ref = refs
    else:
        x_ref, o_ref = refs
        r_ref = None
    x = x_ref[...]                               # (H*W, ct) f32
    inv_n = 1.0 / x.shape[0]
    mean = jnp.sum(x, axis=0, keepdims=True) * inv_n
    diff = x - mean
    var = jnp.sum(diff * diff, axis=0, keepdims=True) * inv_n
    y = diff * jax.lax.rsqrt(var + eps)
    if has_res:
        y = y + r_ref[...]
    if relu:
        y = jnp.maximum(y, 0.0)
    o_ref[...] = y


def instance_norm_act(x, *, relu, residual=None):
    N, H, W, C = x.shape
    hw = H * W
    ct = 128 if C % 128 == 0 else C
    inputs = [x.reshape(N, hw, C)]
    in_specs = [pl.BlockSpec((None, hw, ct), lambda n, c: (n, 0, c))]
    if residual is not None:
        inputs.append(residual.reshape(N, hw, C))
        in_specs.append(pl.BlockSpec((None, hw, ct), lambda n, c: (n, 0, c)))
    out = pl.pallas_call(
        functools.partial(_in_act_kernel, relu=relu,
                          has_res=residual is not None),
        out_shape=jax.ShapeDtypeStruct((N, hw, C), jnp.float32),
        grid=(N, C // ct),
        in_specs=in_specs,
        out_specs=pl.BlockSpec((None, hw, ct), lambda n, c: (n, 0, c)),
        compiler_params=pltpu.CompilerParams(
            dimension_semantics=("parallel", "parallel")),
    )(*inputs)
    return out.reshape(N, H, W, C)


# ------------------------------- conv glue ---------------------------------
_DIRECT_VMEM_BUDGET = 20 * 1024 * 1024  # stay well under the 32 MiB scoped default


def _im2col(x, kh, kw, stride):
    N, H, W, C = x.shape
    Ho = (H - kh) // stride + 1
    Wo = (W - kw) // stride + 1
    cols = []
    for i in range(kh):
        for j in range(kw):
            cols.append(x[:, i:i + stride * Ho:stride, j:j + stride * Wo:stride, :])
    patches = jnp.stack(cols, axis=3)            # (N, Ho, Wo, kh*kw, C)
    return patches.reshape(N * Ho * Wo, kh * kw * C), (N, Ho, Wo)


def conv2d(x, w, b, *, stride=1, pad=0, pad_mode="reflect",
           norm=False, relu=False, tanh_act=False, residual=None):
    """x: NHWC, w: (kh, kw, Cin, Cout) HWIO, b: (Cout,).  Optionally fuses
    InstanceNorm / ReLU / residual-add / tanh into the conv epilogue."""
    kh, kw, Cin, Cout = w.shape
    pad_spec = ((pad, pad), (pad, pad)) if isinstance(pad, int) else pad
    if pad_spec != ((0, 0), (0, 0)):
        x = jnp.pad(x, ((0, 0), pad_spec[0], pad_spec[1], (0, 0)), mode=pad_mode)
    N, Hp, Wp, _ = x.shape
    Ho = (Hp - kh) // stride + 1
    Wo = (Wp - kw) // stride + 1
    ct = 128 if Cout % 128 == 0 else Cout
    est = (2 * (Hp * Wp + kw) * Cin * 4 + 4 * Ho * Wp * ct * 4
           + (2 * Ho * Wp * ct * 4 if residual is not None else 0)
           + 2 * kh * kw * Cin * ct * 2)
    if stride == 1 and est <= _DIRECT_VMEM_BUDGET:
        return _conv_flat(x, w, b, norm=norm, relu=relu, tanh_act=tanh_act,
                          residual=residual)
    # Strided / oversized fallback: im2col + tiled MXU matmul.
    patches, (n, ho, wo) = _im2col(x, kh, kw, stride)
    y = _pallas_matmul_bias(patches, w.reshape(kh * kw * Cin, Cout), b)
    y = y.reshape(n, ho, wo, Cout)
    if norm:
        return instance_norm_act(y, relu=relu, residual=residual)
    if residual is not None:
        y = y + residual
    if relu:
        y = jnp.maximum(y, 0.0)
    if tanh_act:
        y = jnp.tanh(y)
    return y


def conv_transpose2d_s2(x, w, b):
    """ConvTranspose2d(k=3, stride=2, padding=1, output_padding=1) equivalent
    (same math as zero-dilating the input and running a 3x3 stride-1 conv with
    the HWIO kernel), computed as 4 sub-pixel phase convolutions so no MXU MACs
    or HBM traffic are spent on the dilation zeros."""
    # TODO(synk): loading pretrained PyTorch ConvTranspose2d weights would also
    # require the spatial flip + (Cin, Cout) axis swap of the kernel.
    N, H, W, _ = x.shape
    Cout = w.shape[-1]
    ee = conv2d(x, w[1:2, 1:2], b, pad=((0, 0), (0, 0)), pad_mode="constant")
    eo = conv2d(x, w[1:2, 0::2], b, pad=((0, 0), (0, 1)), pad_mode="constant")
    oe = conv2d(x, w[0::2, 1:2], b, pad=((0, 1), (0, 0)), pad_mode="constant")
    oo = conv2d(x, w[0::2, 0::2], b, pad=((0, 1), (0, 1)), pad_mode="constant")
    row_e = jnp.stack([ee, eo], axis=3)          # (N, H, W, 2, Cout)
    row_o = jnp.stack([oe, oo], axis=3)
    y = jnp.stack([row_e, row_o], axis=2)        # (N, H, 2, W, 2, Cout)
    return y.reshape(N, 2 * H, 2 * W, Cout)


# ------------------------------ generator ----------------------------------
def generator_forward(params, x):
    # x: NHWC
    x = conv2d(x, params["initial"]["w"], params["initial"]["b"],
               pad=3, pad_mode="reflect", norm=True, relu=True)
    for dp in params["down"]:
        x = conv2d(x, dp["w"], dp["b"], stride=2, pad=1, pad_mode="reflect",
                   norm=True, relu=True)
    for rp in params["res"]:
        h = conv2d(x, rp[0]["w"], rp[0]["b"], pad=1, pad_mode="reflect",
                   norm=True, relu=True)
        # residual skip fused into the second conv's IN epilogue
        x = conv2d(h, rp[1]["w"], rp[1]["b"], pad=1, pad_mode="reflect",
                   norm=True, relu=False, residual=x)
    for up in params["up"]:
        y = conv_transpose2d_s2(x, up["w"], up["b"])
        x = instance_norm_act(y, relu=True)
    # final 7x7 conv with tanh fused into the conv epilogue
    return conv2d(x, params["last"]["w"], params["last"]["b"],
                  pad=3, pad_mode="reflect", tanh_act=True)


def init_generator_params(key, in_channels=3, gen_features=(64, 128, 256),
                          n_residuals=9):
    keys = iter(jax.random.split(key, 64))

    def conv_p(kh, kw, ci, co):
        return {
            "w": jax.random.normal(next(keys), (kh, kw, ci, co), jnp.float32) * 0.02,
            "b": jnp.zeros((co,), jnp.float32),
        }

    f0, f1, f2 = gen_features
    return {
        "initial": conv_p(7, 7, in_channels, f0),
        "down": [conv_p(3, 3, f0, f1), conv_p(3, 3, f1, f2)],
        "res": [[conv_p(3, 3, f2, f2), conv_p(3, 3, f2, f2)]
                for _ in range(n_residuals)],
        "up": [conv_p(3, 3, f2, f1), conv_p(3, 3, f1, f0)],
        "last": conv_p(7, 7, f0, in_channels),
    }


# ------------------------------ CycleGAN ------------------------------------
def cyclegan_forward(params, X, Y):
    """CycleGAN.forward: returns (X_fake, Y_fake) = (gen_X(Y), gen_Y(X)).
    X, Y are NCHW (PyTorch layout); outputs are NCHW."""
    Xh = jnp.transpose(X, (0, 2, 3, 1))
    Yh = jnp.transpose(Y, (0, 2, 3, 1))
    X_fake = generator_forward(params["gen_X"], Yh)
    Y_fake = generator_forward(params["gen_Y"], Xh)
    return (jnp.transpose(X_fake, (0, 3, 1, 2)),
            jnp.transpose(Y_fake, (0, 3, 1, 2)))

# TODO(synk): Discriminators / loss_D / loss_G and the pretrained-VGG19 perceptual
# loss are not part of CycleGAN.forward and are not implemented here.


if __name__ == "__main__":
    key = jax.random.PRNGKey(0)
    kx, ky, kpx, kpy, kc = jax.random.split(key, 5)

    # ---- lightweight correctness cross-checks of the Pallas kernels vs XLA ----
    def ref_conv(x, w, b, stride=1, pad=0, pad_mode="reflect"):
        if pad:
            x = jnp.pad(x, ((0, 0), (pad, pad), (pad, pad), (0, 0)), mode=pad_mode)
        y = jax.lax.conv_general_dilated(
            x, w, (stride, stride), "VALID",
            dimension_numbers=("NHWC", "HWIO", "NHWC"))
        return y + b

    def ref_in(x, relu):
        m = jnp.mean(x, axis=(1, 2), keepdims=True)
        v = jnp.mean((x - m) ** 2, axis=(1, 2), keepdims=True)
        y = (x - m) * jax.lax.rsqrt(v + 1e-5)
        return jnp.maximum(y, 0.0) if relu else y

    ks = jax.random.split(kc, 4)
    xt = jax.random.normal(ks[0], (2, 10, 10, 16), jnp.float32)
    wt = jax.random.normal(ks[1], (3, 3, 16, 32), jnp.float32) * 0.05
    bt = jax.random.normal(ks[2], (32,), jnp.float32) * 0.1
    rt = jax.random.normal(ks[3], (2, 10, 10, 32), jnp.float32)

    assert float(jnp.max(jnp.abs(
        conv2d(xt, wt, bt, pad=1) - ref_conv(xt, wt, bt, pad=1)))) < 5e-2
    assert float(jnp.max(jnp.abs(
        conv2d(xt, wt, bt, stride=2, pad=1)
        - ref_conv(xt, wt, bt, stride=2, pad=1)))) < 5e-2
    assert float(jnp.max(jnp.abs(
        instance_norm_act(ref_conv(xt, wt, bt, pad=1), relu=True)
        - ref_in(ref_conv(xt, wt, bt, pad=1), True)))) < 1e-3
    assert float(jnp.max(jnp.abs(
        conv2d(xt, wt, bt, pad=1, norm=True, relu=False, residual=rt)
        - (ref_in(ref_conv(xt, wt, bt, pad=1), False) + rt)))) < 1e-1

    def ref_convt(x, w, b):
        n, h, ww, c = x.shape
        xd = jnp.zeros((n, 2 * h - 1, 2 * ww - 1, c), x.dtype)
        xd = xd.at[:, ::2, ::2, :].set(x)
        xd = jnp.pad(xd, ((0, 0), (1, 2), (1, 2), (0, 0)))
        return ref_conv(xd, w, b)

    assert float(jnp.max(jnp.abs(
        conv_transpose2d_s2(xt, wt, bt) - ref_convt(xt, wt, bt)))) < 5e-2

    # -------------------------- full forward pass ---------------------------
    B, C, H, W = 2, 3, 16, 16
    X = jax.random.normal(kx, (B, C, H, W), jnp.float32)
    Y = jax.random.normal(ky, (B, C, H, W), jnp.float32)

    params = {
        "gen_X": init_generator_params(kpx),
        "gen_Y": init_generator_params(kpy),
    }

    fwd = jax.jit(cyclegan_forward)
    X_fake, Y_fake = fwd(params, X, Y)
    jax.block_until_ready((X_fake, Y_fake))

    assert X_fake.shape == (B, C, H, W) and Y_fake.shape == (B, C, H, W)
    assert bool(jnp.all(jnp.isfinite(X_fake))) and bool(jnp.all(jnp.isfinite(Y_fake)))
    assert bool(jnp.all(jnp.abs(X_fake) <= 1.0)) and bool(jnp.all(jnp.abs(Y_fake) <= 1.0))
    print("KERNEL_OK")
</pallas_src>

<mosaic_0001>
module attributes {stable_mosaic.version = 11 : i64} {
  func.func @_conv_flat_kernel(%arg0: i32, %arg1: i32, %arg2: memref<1x146x16xf32, #tpu.memory_space<vmem>>, %arg3: memref<9x16x32xbf16, #tpu.memory_space<vmem>>, %arg4: memref<1x32xf32, #tpu.memory_space<vmem>>, %arg5: memref<1x120x32xf32, #tpu.memory_space<vmem>>) attributes {dimension_semantics = [#tpu.dimension_semantics<parallel>, #tpu.dimension_semantics<parallel>], iteration_bounds = array<i64: 2, 1>, scalar_prefetch = 0 : i64, scratch_operands = 0 : i64, tpu.core_type = #tpu.core_type<tc>, window_params = [{transform_indices = @transform_0, window_bounds = array<i64: 1, 146, 16>}, {transform_indices = @transform_1, window_bounds = array<i64: 9, 16, 32>}, {transform_indices = @transform_2, window_bounds = array<i64: 1, 32>}, {transform_indices = @transform_3, window_bounds = array<i64: 1, 120, 32>}]} {
    %c0 = arith.constant 0 : index
    %c0_0 = arith.constant 0 : index
    %0 = vector.load %arg4[%c0, %c0_0] : memref<1x32xf32, #tpu.memory_space<vmem>>, vector<1x32xf32>
    %1 = vector.shape_cast %0 : vector<1x32xf32> to vector<1x32xf32>
    %2 = vector.broadcast %1 : vector<1x32xf32> to vector<120x32xf32>
    %c0_1 = arith.constant 0 : index
    %c0_2 = arith.constant 0 : index
    %c0_3 = arith.constant 0 : index
    %3 = vector.load %arg2[%c0_1, %c0_2, %c0_3] : memref<1x146x16xf32, #tpu.memory_space<vmem>>, vector<1x120x16xf32>
    %4 = vector.shape_cast %3 : vector<1x120x16xf32> to vector<120x16xf32>
    %5 = arith.truncf %4 : vector<120x16xf32> to vector<120x16xbf16>
    %c0_4 = arith.constant 0 : index
    %c0_5 = arith.constant 0 : index
    %c0_6 = arith.constant 0 : index
    %6 = vector.load %arg3[%c0_4, %c0_5, %c0_6] : memref<9x16x32xbf16, #tpu.memory_space<vmem>>, vector<1x16x32xbf16>
    %7 = vector.shape_cast %6 : vector<1x16x32xbf16> to vector<16x32xbf16>
    %cst = arith.constant dense<0.000000e+00> : vector<120x32xf32>
    %8 = tpu.matmul %5, %7, %cst {dimension_numbers = #tpu.dot_dimension_numbers<[1], [0], [0], [1], [0, 0, 1, 1], [], []>} : vector<120x16xbf16>, vector<16x32xbf16>, vector<120x32xf32> -> vector<120x32xf32>
    %9 = arith.addf %2, %8 : vector<120x32xf32>
    %c0_7 = arith.constant 0 : index
    %c1 = arith.constant 1 : index
    %c0_8 = arith.constant 0 : index
    %10 = vector.load %arg2[%c0_7, %c1, %c0_8] : memref<1x146x16xf32, #tpu.memory_space<vmem>>, vector<1x120x16xf32>
    %11 = vector.shape_cast %10 : vector<1x120x16xf32> to vector<120x16xf32>
    %12 = arith.truncf %11 : vector<120x16xf32> to vector<120x16xbf16>
    %c1_9 = arith.constant 1 : index
    %c0_10 = arith.constant 0 : index
    %c0_11 = arith.constant 0 : index
    %13 = vector.load %arg3[%c1_9, %c0_10, %c0_11] : memref<9x16x32xbf16, #tpu.memory_space<vmem>>, vector<1x16x32xbf16>
    %14 = vector.shape_cast %13 : vector<1x16x32xbf16> to vector<16x32xbf16>
    %cst_12 = arith.constant dense<0.000000e+00> : vector<120x32xf32>
    %15 = tpu.matmul %12, %14, %cst_12 {dimension_numbers = #tpu.dot_dimension_numbers<[1], [0], [0], [1], [0, 0, 1, 1], [], []>} : vector<120x16xbf16>, vector<16x32xbf16>, vector<120x32xf32> -> vector<120x32xf32>
    %16 = arith.addf %9, %15 : vector<120x32xf32>
    %c0_13 = arith.constant 0 : index
    %c2 = arith.constant 2 : index
    %c0_14 = arith.constant 0 : index
    %17 = vector.load %arg2[%c0_13, %c2, %c0_14] : memref<1x146x16xf32, #tpu.memory_space<vmem>>, vector<1x120x16xf32>
    %18 = vector.shape_cast %17 : vector<1x120x16xf32> to vector<120x16xf32>
    %19 = arith.truncf %18 : vector<120x16xf32> to vector<120x16xbf16>
    %c2_15 = arith.constant 2 : index
    %c0_16 = arith.constant 0 : index
    %c0_17 = arith.constant 0 : index
    %20 = vector.load %arg3[%c2_15, %c0_16, %c0_17] : memref<9x16x32xbf16, #tpu.memory_space<vmem>>, vector<1x16x32xbf16>
    %21 = vector.shape_cast %20 : vector<1x16x32xbf16> to vector<16x32xbf16>
    %cst_18 = arith.constant dense<0.000000e+00> : vector<120x32xf32>
    %22 = tpu.matmul %19, %21, %cst_18 {dimension_numbers = #tpu.dot_dimension_numbers<[1], [0], [0], [1], [0, 0, 1, 1], [], []>} : vector<120x16xbf16>, vector<16x32xbf16>, vector<120x32xf32> -> vector<120x32xf32>
    %23 = arith.addf %16, %22 : vector<120x32xf32>
    %c0_19 = arith.constant 0 : index
    %c12 = arith.constant 12 : index
    %c0_20 = arith.constant 0 : index
    %24 = vector.load %arg2[%c0_19, %c12, %c0_20] : memref<1x146x16xf32, #tpu.memory_space<vmem>>, vector<1x120x16xf32>
    %25 = vector.shape_cast %24 : vector<1x120x16xf32> to vector<120x16xf32>
    %26 = arith.truncf %25 : vector<120x16xf32> to vector<120x16xbf16>
    %c3 = arith.constant 3 : index
    %c0_21 = arith.constant 0 : index
    %c0_22 = arith.constant 0 : index
    %27 = vector.load %arg3[%c3, %c0_21, %c0_22] : memref<9x16x32xbf16, #tpu.memory_space<vmem>>, vector<1x16x32xbf16>
    %28 = vector.shape_cast %27 : vector<1x16x32xbf16> to vector<16x32xbf16>
    %cst_23 = arith.constant dense<0.000000e+00> : vector<120x32xf32>
    %29 = tpu.matmul %26, %28, %cst_23 {dimension_numbers = #tpu.dot_dimension_numbers<[1], [0], [0], [1], [0, 0, 1, 1], [], []>} : vector<120x16xbf16>, vector<16x32xbf16>, vector<120x32xf32> -> vector<120x32xf32>
    %30 = arith.addf %23, %29 : vector<120x32xf32>
    %c0_24 = arith.constant 0 : index
    %c13 = arith.constant 13 : index
    %c0_25 = arith.constant 0 : index
    %31 = vector.load %arg2[%c0_24, %c13, %c0_25] : memref<1x146x16xf32, #tpu.memory_space<vmem>>, vector<1x120x16xf32>
    %32 = vector.shape_cast %31 : vector<1x120x16xf32> to vector<120x16xf32>
    %33 = arith.truncf %32 : vector<120x16xf32> to vector<120x16xbf16>
    %c4 = arith.constant 4 : index
    %c0_26 = arith.constant 0 : index
    %c0_27 = arith.constant 0 : index
    %34 = vector.load %arg3[%c4, %c0_26, %c0_27] : memref<9x16x32xbf16, #tpu.memory_space<vmem>>, vector<1x16x32xbf16>
    %35 = vector.shape_cast %34 : vector<1x16x32xbf16> to vector<16x32xbf16>
    %cst_28 = arith.constant dense<0.000000e+00> : vector<120x32xf32>
    %36 = tpu.matmul %33, %35, %cst_28 {dimension_numbers = #tpu.dot_dimension_numbers<[1], [0], [0], [1], [0, 0, 1, 1], [], []>} : vector<120x16xbf16>, vector<16x32xbf16>, vector<120x32xf32> -> vector<120x32xf32>
    %37 = arith.addf %30, %36 : vector<120x32xf32>
    %c0_29 = arith.constant 0 : index
    %c14 = arith.constant 14 : index
    %c0_30 = arith.constant 0 : index
    %38 = vector.load %arg2[%c0_29, %c14, %c0_30] : memref<1x146x16xf32, #tpu.memory_space<vmem>>, vector<1x120x16xf32>
    %39 = vector.shape_cast %38 : vector<1x120x16xf32> to vector<120x16xf32>
    %40 = arith.truncf %39 : vector<120x16xf32> to vector<120x16xbf16>
    %c5 = arith.constant 5 : index
    %c0_31 = arith.constant 0 : index
    %c0_32 = arith.constant 0 : index
    %41 = vector.load %arg3[%c5, %c0_31, %c0_32] : memref<9x16x32xbf16, #tpu.memory_space<vmem>>, vector<1x16x32xbf16>
    %42 = vector.shape_cast %41 : vector<1x16x32xbf16> to vector<16x32xbf16>
    %cst_33 = arith.constant dense<0.000000e+00> : vector<120x32xf32>
    %43 = tpu.matmul %40, %42, %cst_33 {dimension_numbers = #tpu.dot_dimension_numbers<[1], [0], [0], [1], [0, 0, 1, 1], [], []>} : vector<120x16xbf16>, vector<16x32xbf16>, vector<120x32xf32> -> vector<120x32xf32>
    %44 = arith.addf %37, %43 : vector<120x32xf32>
    %c0_34 = arith.constant 0 : index
    %c24 = arith.constant 24 : index
    %c0_35 = arith.constant 0 : index
    %45 = vector.load %arg2[%c0_34, %c24, %c0_35] : memref<1x146x16xf32, #tpu.memory_space<vmem>>, vector<1x120x16xf32>
    %46 = vector.shape_cast %45 : vector<1x120x16xf32> to vector<120x16xf32>
    %47 = arith.truncf %46 : vector<120x16xf32> to vector<120x16xbf16>
    %c6 = arith.constant 6 : index
    %c0_36 = arith.constant 0 : index
    %c0_37 = arith.constant 0 : index
    %48 = vector.load %arg3[%c6, %c0_36, %c0_37] : memref<9x16x32xbf16, #tpu.memory_space<vmem>>, vector<1x16x32xbf16>
    %49 = vector.shape_cast %48 : vector<1x16x32xbf16> to vector<16x32xbf16>
    %cst_38 = arith.constant dense<0.000000e+00> : vector<120x32xf32>
    %50 = tpu.matmul %47, %49, %cst_38 {dimension_numbers = #tpu.dot_dimension_numbers<[1], [0], [0], [1], [0, 0, 1, 1], [], []>} : vector<120x16xbf16>, vector<16x32xbf16>, vector<120x32xf32> -> vector<120x32xf32>
    %51 = arith.addf %44, %50 : vector<120x32xf32>
    %c0_39 = arith.constant 0 : index
    %c25 = arith.constant 25 : index
    %c0_40 = arith.constant 0 : index
    %52 = vector.load %arg2[%c0_39, %c25, %c0_40] : memref<1x146x16xf32, #tpu.memory_space<vmem>>, vector<1x120x16xf32>
    %53 = vector.shape_cast %52 : vector<1x120x16xf32> to vector<120x16xf32>
    %54 = arith.truncf %53 : vector<120x16xf32> to vector<120x16xbf16>
    %c7 = arith.constant 7 : index
    %c0_41 = arith.constant 0 : index
    %c0_42 = arith.constant 0 : index
    %55 = vector.load %arg3[%c7, %c0_41, %c0_42] : memref<9x16x32xbf16, #tpu.memory_space<vmem>>, vector<1x16x32xbf16>
    %56 = vector.shape_cast %55 : vector<1x16x32xbf16> to vector<16x32xbf16>
    %cst_43 = arith.constant dense<0.000000e+00> : vector<120x32xf32>
    %57 = tpu.matmul %54, %56, %cst_43 {dimension_numbers = #tpu.dot_dimension_numbers<[1], [0], [0], [1], [0, 0, 1, 1], [], []>} : vector<120x16xbf16>, vector<16x32xbf16>, vector<120x32xf32> -> vector<120x32xf32>
    %58 = arith.addf %51, %57 : vector<120x32xf32>
    %c0_44 = arith.constant 0 : index
    %c26 = arith.constant 26 : index
    %c0_45 = arith.constant 0 : index
    %59 = vector.load %arg2[%c0_44, %c26, %c0_45] : memref<1x146x16xf32, #tpu.memory_space<vmem>>, vector<1x120x16xf32>
    %60 = vector.shape_cast %59 : vector<1x120x16xf32> to vector<120x16xf32>
    %61 = arith.truncf %60 : vector<120x16xf32> to vector<120x16xbf16>
    %c8 = arith.constant 8 : index
    %c0_46 = arith.constant 0 : index
    %c0_47 = arith.constant 0 : index
    %62 = vector.load %arg3[%c8, %c0_46, %c0_47] : memref<9x16x32xbf16, #tpu.memory_space<vmem>>, vector<1x16x32xbf16>
    %63 = vector.shape_cast %62 : vector<1x16x32xbf16> to vector<16x32xbf16>
    %cst_48 = arith.constant dense<0.000000e+00> : vector<120x32xf32>
    %64 = tpu.matmul %61, %63, %cst_48 {dimension_numbers = #tpu.dot_dimension_numbers<[1], [0], [0], [1], [0, 0, 1, 1], [], []>} : vector<120x16xbf16>, vector<16x32xbf16>, vector<120x32xf32> -> vector<120x32xf32>
    %65 = arith.addf %58, %64 : vector<120x32xf32>
    %c0_49 = arith.constant 0 : index
    %c0_50 = arith.constant 0 : index
    %c0_51 = arith.constant 0 : index
    %66 = vector.load %arg5[%c0_49, %c0_50, %c0_51] : memref<1x120x32xf32, #tpu.memory_space<vmem>>, vector<1x120x32xf32>
    %67 = vector.shape_cast %66 : vector<1x120x32xf32> to vector<120x32xf32>
    %68 = vector.shape_cast %65 : vector<120x32xf32> to vector<1x120x32xf32>
    tpu.vector_store %arg5[%c0_49, %c0_50, %c0_51], %68 {strides = array<i32>} : memref<1x120x32xf32, #tpu.memory_space<vmem>>, vector<1x120x32xf32>,
    return
  }
  func.func @transform_0(%arg0: i32, %arg1: i32) -> (i32, i32, i32) {
    %c0_i32 = arith.constant 0 : i32
    %c0_i32_0 = arith.constant 0 : i32
    %c0_i32_1 = arith.constant 0 : i32
    return %arg0, %c0_i32, %c0_i32_0 : i32, i32, i32
  }
  func.func @transform_1(%arg0: i32, %arg1: i32) -> (i32, i32, i32) {
    %c0_i32 = arith.constant 0 : i32
    %c0_i32_0 = arith.constant 0 : i32
    %c0_i32_1 = arith.constant 0 : i32
    return %c0_i32, %c0_i32_0, %arg1 : i32, i32, i32
  }
  func.func @transform_2(%arg0: i32, %arg1: i32) -> (i32, i32) {
    %c0_i32 = arith.constant 0 : i32
    %c0_i32_0 = arith.constant 0 : i32
    return %c0_i32, %arg1 : i32, i32
  }
  func.func @transform_3(%arg0: i32, %arg1: i32) -> (i32, i32, i32) {
    %c0_i32 = arith.constant 0 : i32
    %c0_i32_0 = arith.constant 0 : i32
    return %arg0, %c0_i32, %arg1 : i32, i32, i32
  }
}

</mosaic_0001>

<bundles_post_ra>
// kernel: tpu_custom_call.1
= control target key start
LH: loop header
LB: loop body
LE: loop exit
PB: predicated region body
PF: predicated region fallthrough
CT: control target
= control target key end

     0   :  { %s2429_s12 = smov 0   ;;  %s2431_s13 = smov 0   ;;  %s2879_s0 = inlined_call_operand.vmem [shape: f32[2,146,16], index: 0, kind: input, shape index: {}]   ;;  %s2880_s1 = inlined_call_operand.vmem [shape: bf16[9,16,32], index: 1, kind: input, shape index: {}]   ;;  %s2881_s2 = inlined_call_operand.vmem [shape: f32[1,32], index: 2, kind: input, shape index: {}]   ;;  %s2882_s3 = inlined_call_operand.vmem [shape: f32[2,120,32], index: 3, kind: output, shape index: {}]  }
   0x1   :  { %s2433_s14 = smov 0  }
   0x2 LB: > { %s25_s15 = sadd.s32 1, %s2403_s13  ;;  %p1860_p0 = scmp.ge.s32.totalorder %s2407_s14, 1  ;;  %s2407_s14 = sphi %s2433_s14, %s13_s14   ;;  %s2403_s13 = sphi %s2431_s13, %s2884_s13   ;;  %s2399_s12 = sphi %s2429_s12, %s2883_s12  }
   0x3   : > { %p27_p1 = scmp.ge.s32.totalorder %s25_s15, 2  ;;  %p168_p2 = scmp.lt.s32.totalorder %s2407_s14, 3 }
   0x5   : > { %s2886_s15 = smov (%p27_p1, %s25_s15), 0  ;;  %p169_p3 = pnand %p1860_p0, %p168_p2 }
   0x6   : > { %v2376_v0 = vld [vmem:[%s2880_s1] sm:$0xff] (!%p169_p3)   ;;  %p202_p4 = scmp.lt.s32.totalorder (!%p169_p3), %s2399_s12, 1  ;;  %v2378_v2 = vld [vmem:[%s2880_s1 + $0x8] sm:$0xff] (!%p169_p3)   ;;  %vm261_vm0 = vcmask (!%p169_p3), 130048   ;;  %v2380_v11 = vld [vmem:[%s2880_s1 + $0x30] sm:$0xff] (!%p169_p3)   ;;  %vm1733_vm1 = vcmask (!%p169_p3), 261120  }
   0x7   : > { %172 = sbr.rel (%p169_p3) target bundleno = 379 (0x17b), region = 32  ;;  %v2453_v1 = vld [vmem:[%s2880_s1 + $0x20] sm:$0xff] (!%p169_p3)   ;;  %2044 = vmatprep.subr.bf16.mxu1 (!%p169_p3), %v2376_v0  ;;  %v2379_v3 = vld [vmem:[%s2880_s1 + $0x28] sm:$0xff] (!%p169_p3)   ;;  %v2501_v23 = vld [vmem:[%s2880_s1 + $0x10] sm:$0xff] (!%p169_p3)  }
   0x8   : > { %2045 = vmatpush3.bf16.msra.mxu1 (!%p169_p3), %v2376_v0  ;;  %2116 = vmatprep.subr.bf16.mxu0 (!%p169_p3), %v2453_v1  ;;  %v2554_v48 = vld [vmem:[%s2880_s1 + $0x38] sm:$0xff] (!%p169_p3)  }
   0x9   : > { %2117 = vmatpush3.bf16.msra.mxu0 (!%p169_p3), %v2453_v1  ;;  %2062 = vmatprep.subr.bf16.mxu1 (!%p169_p3), %v2378_v2 }
   0xa   : > { %2134 = vmatprep.subr.bf16.mxu0 (!%p169_p3), %v2379_v3 }
   0xe   : > { %s2888_s12 = smov (!%p202_p4, %s2399_s12), 1 }
   0xf   : > { %s2350_s24 = smul.u32 152, %s2888_s12 }
  0x10   : > { %s2351_s17 = smul.u32 120, %s2888_s12 }
  0x11   : > { %s2469_s27 = scalar_lea.vmem %s2879_s0, %s2350_s24 }
  0x12   : > { %v230_v4 = vld [vmem:[%s2469_s27] sm:$0xff]  ;;  %v231_v5 = vld [vmem:[%s2469_s27 + $0x8] sm:$0xff]  ;;  %v899_v8 = vld [vmem:[%s2469_s27 + $0x15] sm:$0xff]  ;;  %s2825_s20 = scalar_lea.vmem %s2882_s3, %s2351_s17 }
  0x13   : > { %v898_v6 = vld [vmem:[%s2469_s27 + $0xd] sm:$0xff]  ;;  %v245_v7 = vpack.c.bf16 %v231_v5, %v230_v4  ;;  %v2477_v10 = vld [vmem:[%s2469_s27 + $0x18] sm:$0xff]  ;;  %v901_v15 = vld [vmem:[%s2469_s27 + $0x25] sm:$0xff] }
  0x14   : > { %v232_v9 = vld [vmem:[%s2469_s27 + $0x10] sm:$0xff]  ;;  %v913_v12 = vpack.c.bf16 %v899_v8, %v898_v6  ;;  %v900_v14 = vld [vmem:[%s2469_s27 + $0x1d] sm:$0xff]  ;;  %v2490_v18 = vld [vmem:[%s2469_s27 + $0x28] sm:$0xff] }
  0x15   : > { %v246_v13 = vpack.c.bf16 %v2477_v10, %v232_v9  ;;  %v2486_v16 = vld [vmem:[%s2469_s27 + $0x20] sm:$0xff]  ;;  %2046 = vmatprep.mubr.msk.bf16.mxu1 %vm261_vm0, %v245_v7  ;;  %v914_v17 = vpack.c.bf16 %v901_v15, %v900_v14  ;;  %v902_v19 = vld [vmem:[%s2469_s27 + $0x2d] sm:$0xff]  ;;  %v903_v20 = vld [vmem:[%s2469_s27 + $0x35] sm:$0xff] }
  0x16   : > { %2118 = vmatprep.mubr.msk.bf16.mxu0 %vm261_vm0, %v913_v12  ;;  %v247_v21 = vpack.c.bf16 %v2490_v18, %v2486_v16  ;;  %v915_v22 = vpack.c.bf16 %v903_v20, %v902_v19  ;;  %v2505_v24 = vld [vmem:[%s2469_s27 + $0x30] sm:$0xff]  ;;  %v2508_v25 = vld [vmem:[%s2469_s27 + $0x38] sm:$0xff]  ;;  %v905_v27 = vld [vmem:[%s2469_s27 + $0x45] sm:$0xff] }
  0x17   : > { %2047 = vmatmul.mubr.msk.bf16.vlgmr.msra.gmra.mrb[0].mxu1 %vm261_vm0, %v246_v13  ;;  %2119 = vmatmul.mubr.msk.bf16.vlgmr.msra.gmra.mrb[0].mxu0 %vm261_vm0, %v914_v17  ;;  %v904_v26 = vld [vmem:[%s2469_s27 + $0x3d] sm:$0xff]  ;;  %v2517_v29 = vld [vmem:[%s2469_s27 + $0x48] sm:$0xff]  ;;  %v248_v32 = vpack.c.bf16 %v2508_v25, %v2505_v24  ;;  %v2531_v36 = vld [vmem:[%s2469_s27 + $0x50] sm:$0xff] }
  0x18   : > { %2063 = vmatpush3.bf16.msra.mxu1 %v2378_v2  ;;  %2135 = vmatpush3.bf16.msra.mxu0 %v2379_v3  ;;  %v2514_v28 = vld [vmem:[%s2469_s27 + $0x40] sm:$0xff]  ;;  %v1065_v30 = vld [vmem:[%s2469_s27 + $0xe] sm:$0xff]  ;;  %v1066_v31 = vld [vmem:[%s2469_s27 + $0x16] sm:$0xff]  ;;  %v916_v33 = vpack.c.bf16 %v905_v27, %v904_v26 }
  0x19   : > { %2050 = vmatprep.mubr.msk.bf16.mxu1 %vm261_vm0, %v247_v21  ;;  %2122 = vmatprep.mubr.msk.bf16.mxu0 %vm261_vm0, %v915_v22  ;;  %v249_v34 = vpack.c.bf16 %v2517_v29, %v2514_v28  ;;  %v1080_v35 = vpack.c.bf16 %v1066_v31, %v1065_v30  ;;  %v2534_v37 = vld [vmem:[%s2469_s27 + $0x58] sm:$0xff]  ;;  %v1068_v39 = vld [vmem:[%s2469_s27 + $0x26] sm:$0xff]  ;;  %v1069_v42 = vld [vmem:[%s2469_s27 + $0x2e] sm:$0xff]  ;;  %v1247_v21 = vpack.c.bf16 %v2486_v16, %v2477_v10 }
  0x1a   : > { %2152 = vmatprep.subr.bf16.mxu0 %v2380_v11  ;;  %2080 = vmatprep.subr.bf16.mxu1 %v2501_v23  ;;  %v1067_v38 = vld [vmem:[%s2469_s27 + $0x1e] sm:$0xff]  ;;  %v2543_v41 = vld [vmem:[%s2469_s27 + $0x68] sm:$0xff]  ;;  %v1070_v43 = vld [vmem:[%s2469_s27 + $0x36] sm:$0xff]  ;;  %v250_v44 = vpack.c.bf16 %v2534_v37, %v2531_v36  ;;  %v1248_v16 = vpack.c.bf16 %v2505_v24, %v2490_v18  ;;  %v1249_v31 = vpack.c.bf16 %v2514_v28, %v2508_v25 }
  0x1b   : > { %v2540_v40 = vld [vmem:[%s2469_s27 + $0x60] sm:$0xff]  ;;  %v1081_v45 = vpack.c.bf16 %v1068_v39, %v1067_v38  ;;  %v1082_v47 = vpack.c.bf16 %v1070_v43, %v1069_v42  ;;  %v2560_v49 = vld [vmem:[%s2469_s27 + $0x70] sm:$0xff]  ;;  %v2383_v9 = vld [vmem:[%s2880_s1 + $0x18] sm:$0xff]   ;;  %v1250_v28 = vpack.c.bf16 %v2531_v36, %v2517_v29 }
  0x1c   : > { %v251_v46 = vpack.c.bf16 %v2543_v41, %v2540_v40  ;;  %v1071_v50 = vld [vmem:[%s2469_s27 + $0x3e] sm:$0xff]  ;;  %v1072_v51 = vld [vmem:[%s2469_s27 + $0x46] sm:$0xff]  ;;  %v1073_v54 = vld [vmem:[%s2469_s27 + $0x4e] sm:$0xff]  ;;  %v252_v56 = vpack.c.bf16 %v2560_v49, %v2560_v49  ;;  %v1252_v43 = vpack.c.bf16 %v2560_v49, %v2543_v41 }
  0x1d   : > { %v397_v52 = vld [vmem:[%s2469_s27 + $0x1] sm:$0xff]  ;;  %v398_v53 = vld [vmem:[%s2469_s27 + $0x9] sm:$0xff]  ;;  %v1074_v55 = vld [vmem:[%s2469_s27 + $0x56] sm:$0xff]  ;;  %v1083_v57 = vpack.c.bf16 %v1072_v51, %v1071_v50 }
  0x1e   : > { %v412_v58 = vpack.c.bf16 %v398_v53, %v397_v52  ;;  %v1084_v59 = vpack.c.bf16 %v1074_v55, %v1073_v54  ;;  %v399_v60 = vld [vmem:[%s2469_s27 + $0x11] sm:$0xff]  ;;  %v2577_v61 = vld [vmem:[%s2469_s27 + $0x19] sm:$0xff]  ;;  %v1076_v63 = vld [vmem:[%s2469_s27 + $0x66] sm:$0xff] }
  0x1f   : > { %2051 = vmatmul.mubr.msk.bf16.gmra.mrb[4].mxu1 %vm261_vm0, %v248_v32  ;;  %2123 = vmatmul.mubr.msk.bf16.gmra.mrb[4].mxu0 %vm261_vm0, %v916_v33  ;;  %v1075_v62 = vld [vmem:[%s2469_s27 + $0x5e] sm:$0xff]  ;;  %v2586_v2 = vld [vmem:[%s2469_s27 + $0x29] sm:$0xff]  ;;  %v1078_v4 = vld [vmem:[%s2469_s27 + $0x76] sm:$0xff]  ;;  %v413_v5 = vpack.c.bf16 %v2577_v61, %v399_v60 }
  0x20   : > { %2054 = vmatprep.mubr.msk.bf16.mxu1 %vm261_vm0, %v249_v34  ;;  %2136 = vmatprep.mubr.msk.bf16.mxu0 %vm261_vm0, %v1080_v35  ;;  %v2583_v0 = vld [vmem:[%s2469_s27 + $0x21] sm:$0xff]  ;;  %v1077_v3 = vld [vmem:[%s2469_s27 + $0x6e] sm:$0xff]  ;;  %v1085_v6 = vpack.c.bf16 %v1076_v63, %v1075_v62  ;;  %v2603_v12 = vld [vmem:[%s2469_s27 + $0x39] sm:$0xff]  ;;  %v1251_v35 = vpack.c.bf16 %v2540_v40, %v2534_v37 }
  0x21   : > { %v414_v7 = vpack.c.bf16 %v2586_v2, %v2583_v0  ;;  %v1086_v8 = vpack.c.bf16 %v1078_v4, %v1077_v3  ;;  %v1079_v13 = vld [vmem:[%s2469_s27 + $0x7e] sm:$0xff]  ;;  %v2612_v15 = vld [vmem:[%s2469_s27 + $0x49] sm:$0xff]  ;;  %v2624_v22 = vld [vmem:[%s2469_s27 + $0x51] sm:$0xff]  ;;  %v1414_v53 = vpack.c.bf16 %v2583_v0, %v2577_v61 }
  0x22   : > { %v2609_v14 = vld [vmem:[%s2469_s27 + $0x41] sm:$0xff]  ;;  %v1087_v19 = vpack.c.bf16 %v1079_v13, %v1079_v13  ;;  %v2634_v27 = vld [vmem:[%s2469_s27 + $0x69] sm:$0xff]  ;;  %v2651_v33 = vld [vmem:[%s2469_s27 + $0x71] sm:$0xff]  ;;  %v1417_v3 = vpack.c.bf16 %v2624_v22, %v2612_v15 }
  0x23   : > { %v416_v20 = vpack.c.bf16 %v2612_v15, %v2609_v14  ;;  %v2631_v26 = vld [vmem:[%s2469_s27 + $0x61] sm:$0xff]  ;;  %v565_v24 = vld [vmem:[%s2469_s27 + $0xa] sm:$0xff]  ;;  %v419_v25 = vpack.c.bf16 %v2651_v33, %v2651_v33  ;;  %v566_v38 = vld [vmem:[%s2469_s27 + $0x12] sm:$0xff]  ;;  %v1416_v61 = vpack.c.bf16 %v2609_v14, %v2603_v12  ;;  %v1419_v14 = vpack.c.bf16 %v2651_v33, %v2634_v27 }
  0x24   : > { %v418_v30 = vpack.c.bf16 %v2634_v27, %v2631_v26  ;;  %v2384_v32 = vld [vmem:[%s2880_s1 + $0x40] sm:$0xff]   ;;  %v2675_v29 = vld [vmem:[%s2469_s27 + $0x2a] sm:$0xff]  ;;  %v1244_v36 = vld [vmem:[%s2469_s27 + $0x78] sm:$0xff] }
  0x25   : > { %v564_v18 = vld [vmem:[%s2469_s27 + $0x2] sm:$0xff]  ;;  %v2668_v39 = vld [vmem:[%s2469_s27 + $0x1a] sm:$0xff]  ;;  %v2699_v49 = vld [vmem:[%s2469_s27 + $0x4a] sm:$0xff] }
  0x26   : > { %v579_v34 = vpack.c.bf16 %v565_v24, %v564_v18  ;;  %v2672_v42 = vld [vmem:[%s2469_s27 + $0x22] sm:$0xff]  ;;  %v580_v40 = vpack.c.bf16 %v2668_v39, %v566_v38  ;;  %v2712_v54 = vld [vmem:[%s2469_s27 + $0x52] sm:$0xff]  ;;  %v2715_v55 = vld [vmem:[%s2469_s27 + $0x5a] sm:$0xff] }
  0x27   : > { %2055 = vmatmul.mubr.msk.bf16.gmra.mrb[8].mxu1 %vm261_vm0, %v250_v44  ;;  %2137 = vmatmul.mubr.msk.bf16.vlgmr.msra.gmra.mrb[0].mxu0 %vm261_vm0, %v1081_v45  ;;  %v1245_v37 = vld [vmem:[%s2469_s27 + $0x80] sm:$0xff]  ;;  %v581_v44 = vpack.c.bf16 %v2675_v29, %v2672_v42  ;;  %v1246_v41 = vld [vmem:[%s2469_s27 + $0x88] sm:$0xff]  ;;  %v2736_v62 = vld [vmem:[%s2469_s27 + $0x72] sm:$0xff] }
  0x28   : > { %2058 = vmatprep.mubr.msk.bf16.mxu1 %vm261_vm0, %v251_v46  ;;  %2153 = vmatpush3.bf16.msra.mxu0 %v2380_v11  ;;  %v2600_v11 = vld [vmem:[%s2469_s27 + $0x31] sm:$0xff]  ;;  %v1253_v45 = vpack.c.bf16 %v1245_v37, %v1244_v36  ;;  %v1254_v51 = vpack.c.bf16 %v1246_v41, %v1246_v41  ;;  %v908_v36 = vld [vmem:[%s2469_s27 + $0x5d] sm:$0xff]  ;;  %v909_v37 = vld [vmem:[%s2469_s27 + $0x65] sm:$0xff] }
  0x29   : > { %2140 = vmatprep.mubr.msk.bf16.mxu0 %vm261_vm0, %v1082_v47  ;;  %2170 = vmatprep.subr.bf16.mxu0 %v2554_v48  ;;  %v415_v17 = vpack.c.bf16 %v2603_v12, %v2600_v11  ;;  %v2687_v46 = vld [vmem:[%s2469_s27 + $0x32] sm:$0xff]  ;;  %v2690_v47 = vld [vmem:[%s2469_s27 + $0x3a] sm:$0xff] }
  0x2a   : > { %v582_v50 = vpack.c.bf16 %v2690_v47, %v2687_v46  ;;  %v731_v63 = vld [vmem:[%s2469_s27 + $0xc] sm:$0xff]  ;;  %v732_v0 = vld [vmem:[%s2469_s27 + $0x14] sm:$0xff]  ;;  %v1412_v12 = vld [vmem:[%s2469_s27 + $0x81] sm:$0xff]  ;;  %v1582_v18 = vpack.c.bf16 %v2687_v46, %v2675_v29  ;;  %v918_v46 = vpack.c.bf16 %v909_v37, %v908_v36 }
  0x2b   : > { %v746_v4 = vpack.c.bf16 %v732_v0, %v731_v63 }
  0x2f   : > { %2059 = vmatmul.mubr.msk.bf16.gmra.mrb[12].mxu1 %vm261_vm0, %v252_v56  ;;  %2141 = vmatmul.mubr.msk.bf16.gmra.mrb[4].mxu0 %vm261_vm0, %v1083_v57  ;;  %v2719_v56 = vld [vmem:[%s2469_s27 + $0x62] sm:$0xff]  ;;  %v2722_v57 = vld [vmem:[%s2469_s27 + $0x6a] sm:$0xff] }
  0x30   : > { %2064 = vmatprep.mubr.msk.bf16.mxu1 %vm261_vm0, %v412_v58  ;;  %2144 = vmatprep.mubr.msk.bf16.mxu0 %vm261_vm0, %v1084_v59  ;;  %v584_v58 = vpack.c.bf16 %v2715_v55, %v2712_v54  ;;  %v1415_v59 = vpack.c.bf16 %v2600_v11, %v2586_v2  ;;  %v585_v60 = vpack.c.bf16 %v2722_v57, %v2719_v56  ;;  %v1411_v11 = vld [vmem:[%s2469_s27 + $0x79] sm:$0xff] }
  0x31   : > { %v586_v2 = vpack.c.bf16 %v2736_v62, %v2736_v62  ;;  %v1585_v29 = vpack.c.bf16 %v2719_v56, %v2715_v55 }
  0x37   : > { %2065 = vmatmul.mubr.msk.bf16.vlgmr.msra.gmra.mrb[0].mxu1 %vm261_vm0, %v413_v5  ;;  %2145 = vmatmul.mubr.msk.bf16.gmra.mrb[8].mxu0 %vm261_vm0, %v1085_v6  ;;  %v733_v6 = vld [vmem:[%s2469_s27 + $0x1c] sm:$0xff] }
  0x38   : > { %2081 = vmatpush3.bf16.msra.mxu1 %v2501_v23  ;;  %2068 = vmatprep.mubr.msk.bf16.mxu1 %vm261_vm0, %v414_v7  ;;  %v2627_v23 = vld [vmem:[%s2469_s27 + $0x59] sm:$0xff]  ;;  %v734_v7 = vld [vmem:[%s2469_s27 + $0x24] sm:$0xff] }
  0x39   : > { %2148 = vmatprep.mubr.msk.bf16.mxu0 %vm261_vm0, %v1086_v8  ;;  %2098 = vmatprep.subr.bf16.mxu1 %v2383_v9  ;;  %v417_v10 = vpack.c.bf16 %v2627_v23, %v2624_v22  ;;  %v1418_v5 = vpack.c.bf16 %v2631_v26, %v2627_v23  ;;  %v735_v8 = vld [vmem:[%s2469_s27 + $0x2c] sm:$0xff]  ;;  %v747_v13 = vpack.c.bf16 %v734_v7, %v733_v6  ;;  %v740_v23 = vld [vmem:[%s2469_s27 + $0x54] sm:$0xff] }
  0x3a   : > { %v739_v22 = vld [vmem:[%s2469_s27 + $0x4c] sm:$0xff] }
  0x3f   : > { %2069 = vmatmul.mubr.msk.bf16.gmra.mrb[4].mxu1 %vm261_vm0, %v415_v17  ;;  %2149 = vmatmul.mubr.msk.bf16.gmra.mrb[12].mxu0 %vm261_vm0, %v1087_v19  ;;  %v1420_v17 = vpack.c.bf16 %v1412_v12, %v1411_v11  ;;  %v737_v19 = vld [vmem:[%s2469_s27 + $0x3c] sm:$0xff] }
  0x40   : > { %2072 = vmatprep.mubr.msk.bf16.mxu1 %vm261_vm0, %v416_v20  ;;  %2154 = vmatprep.mubr.msk.bf16.mxu0 %vm261_vm0, %v1247_v21  ;;  %v738_v20 = vld [vmem:[%s2469_s27 + $0x44] sm:$0xff] }
  0x41   : > { %v1413_v21 = vld [vmem:[%s2469_s27 + $0x89] sm:$0xff]  ;;  %v749_v26 = vpack.c.bf16 %v738_v20, %v737_v19 }
  0x42   : > { %v1421_v27 = vpack.c.bf16 %v1413_v21, %v1413_v21 }
  0x47   : > { %2073 = vmatmul.mubr.msk.bf16.gmra.mrb[8].mxu1 %vm261_vm0, %v417_v10  ;;  %2155 = vmatmul.mubr.msk.bf16.vlgmr.msra.gmra.mrb[0].mxu0 %vm261_vm0, %v1248_v16  ;;  %v750_v10 = vpack.c.bf16 %v740_v23, %v739_v22  ;;  %v741_v16 = vld [vmem:[%s2469_s27 + $0x5c] sm:$0xff] }
  0x48   : > { %2076 = vmatprep.mubr.msk.bf16.mxu1 %vm261_vm0, %v418_v30  ;;  %2171 = vmatpush3.bf16.msra.mxu0 %v2554_v48  ;;  %v2696_v48 = vld [vmem:[%s2469_s27 + $0x42] sm:$0xff] }
  0x49   : > { %2158 = vmatprep.mubr.msk.bf16.mxu0 %vm261_vm0, %v1249_v31  ;;  %2188 = vmatprep.subr.bf16.mxu0 %v2384_v32  ;;  %v583_v52 = vpack.c.bf16 %v2699_v49, %v2696_v48  ;;  %v742_v30 = vld [vmem:[%s2469_s27 + $0x64] sm:$0xff]  ;;  %v743_v31 = vld [vmem:[%s2469_s27 + $0x6c] sm:$0xff] }
  0x4a   : > { %v751_v33 = vpack.c.bf16 %v742_v30, %v741_v16 }
  0x4f   : > { %2077 = vmatmul.mubr.msk.bf16.gmra.mrb[12].mxu1 %vm261_vm0, %v419_v25  ;;  %2159 = vmatmul.mubr.msk.bf16.gmra.mrb[4].mxu0 %vm261_vm0, %v1250_v28  ;;  %v1583_v25 = vpack.c.bf16 %v2696_v48, %v2690_v47  ;;  %v745_v28 = vld [vmem:[%s2469_s27 + $0x7c] sm:$0xff]  ;;  %v1586_v47 = vpack.c.bf16 %v2736_v62, %v2722_v57 }
  0x50   : > { %2082 = vmatprep.mubr.msk.bf16.mxu1 %vm261_vm0, %v579_v34  ;;  %2162 = vmatprep.mubr.msk.bf16.mxu0 %vm261_vm0, %v1251_v35  ;;  %v906_v34 = vld [vmem:[%s2469_s27 + $0x4d] sm:$0xff]  ;;  %v907_v35 = vld [vmem:[%s2469_s27 + $0x55] sm:$0xff]  ;;  %v753_v38 = vpack.c.bf16 %v745_v28, %v745_v28 }
  0x57   : > { %2083 = vmatmul.mubr.msk.bf16.vlgmr.msra.gmra.mrb[0].mxu1 %vm261_vm0, %v580_v40  ;;  %2163 = vmatmul.mubr.msk.bf16.gmra.mrb[8].mxu0 %vm261_vm0, %v1252_v43  ;;  %v910_v40 = vld [vmem:[%s2469_s27 + $0x6d] sm:$0xff]  ;;  %v911_v43 = vld [vmem:[%s2469_s27 + $0x75] sm:$0xff] }
  0x58   : > { %2099 = vmatpush3.bf16.msra.mxu1 %v2383_v9  ;;  %2086 = vmatprep.mubr.msk.bf16.mxu1 %vm261_vm0, %v581_v44  ;;  %v736_v9 = vld [vmem:[%s2469_s27 + $0x34] sm:$0xff]  ;;  %v919_v41 = vpack.c.bf16 %v911_v43, %v910_v40 }
  0x59   : > { %2166 = vmatprep.mubr.msk.bf16.mxu0 %vm261_vm0, %v1253_v45  ;;  %2206 = vmatprep.subr.bf16.mxu1 %v2453_v1  ;;  %v748_v15 = vpack.c.bf16 %v736_v9, %v735_v8  ;;  %v1578_v44 = vld [vmem:[%s2469_s27 + $0x7a] sm:$0xff]  ;;  %v1579_v45 = vld [vmem:[%s2469_s27 + $0x82] sm:$0xff] }
  0x5a   : > { %v1587_v48 = vpack.c.bf16 %v1579_v45, %v1578_v44 }
  0x5f   : > { %2087 = vmatmul.mubr.msk.bf16.gmra.mrb[4].mxu1 %vm261_vm0, %v582_v50  ;;  %2167 = vmatmul.mubr.msk.bf16.gmra.mrb[12].mxu0 %vm261_vm0, %v1254_v51  ;;  %v1580_v50 = vld [vmem:[%s2469_s27 + $0x8a] sm:$0xff] }
  0x60   : > { %2090 = vmatprep.mubr.msk.bf16.mxu1 %vm261_vm0, %v583_v52  ;;  %2172 = vmatprep.mubr.msk.bf16.mxu0 %vm261_vm0, %v1414_v53  ;;  %v1588_v52 = vpack.c.bf16 %v1580_v50, %v1580_v50 }
  0x67   : > { %2091 = vmatmul.mubr.msk.bf16.gmra.mrb[8].mxu1 %vm261_vm0, %v584_v58  ;;  %2173 = vmatmul.mubr.msk.bf16.vlgmr.msra.gmra.mrb[0].mxu0 %vm261_vm0, %v1415_v59 }
  0x68   : > { %2094 = vmatprep.mubr.msk.bf16.mxu1 %vm261_vm0, %v585_v60  ;;  %2189 = vmatpush3.bf16.msra.mxu0 %v2384_v32  ;;  %v744_v32 = vld [vmem:[%s2469_s27 + $0x74] sm:$0xff] }
  0x69   : > { %2176 = vmatprep.mubr.msk.bf16.mxu0 %vm261_vm0, %v1416_v61  ;;  %v752_v24 = vpack.c.bf16 %v744_v32, %v743_v31  ;;  %v2817_v61 = vld [vmem:[%s2881_s2] ss:$0 sm:$0xff] }
  0x6f   : > { %2095 = vmatmul.mubr.msk.bf16.gmra.mrb[12].mxu1 %vm261_vm0, %v586_v2  ;;  %2177 = vmatmul.mubr.msk.bf16.gmra.mrb[4].mxu0 %vm261_vm0, %v1417_v3 }
  0x70   : > { %2100 = vmatprep.mubr.msk.bf16.mxu1 %vm261_vm0, %v746_v4  ;;  %2180 = vmatprep.mubr.msk.bf16.mxu0 %vm261_vm0, %v1418_v5 }
  0x77   : > { %2101 = vmatmul.mubr.msk.bf16.vlgmr.msra.gmra.mrb[0].mxu1 %vm261_vm0, %v747_v13  ;;  %2181 = vmatmul.mubr.msk.bf16.gmra.mrb[8].mxu0 %vm261_vm0, %v1419_v14 }
  0x78   : > { %2207 = vmatpush3.bf16.msra.mxu1 %v2453_v1  ;;  %2104 = vmatprep.mubr.msk.bf16.mxu1 %vm261_vm0, %v748_v15  ;;  %v1581_v1 = vpack.c.bf16 %v2672_v42, %v2668_v39  ;;  %v1584_v39 = vpack.c.bf16 %v2712_v54, %v2699_v49  ;;  %v917_v42 = vpack.c.bf16 %v907_v35, %v906_v34  ;;  %v912_v49 = vld [vmem:[%s2469_s27 + $0x7d] sm:$0xff] }
  0x79   : > { %2184 = vmatprep.mubr.msk.bf16.mxu0 %vm261_vm0, %v1420_v17  ;;  %v920_v51 = vpack.c.bf16 %v912_v49, %v912_v49 }
  0x7f   : > { %2105 = vmatmul.mubr.msk.bf16.gmra.mrb[4].mxu1 %vm261_vm0, %v749_v26  ;;  %2185 = vmatmul.mubr.msk.bf16.gmra.mrb[12].mxu0 %vm261_vm0, %v1421_v27 }
  0x80   : > { %2108 = vmatprep.mubr.msk.bf16.mxu1 %vm261_vm0, %v750_v10  ;;  %2190 = vmatprep.mubr.msk.bf16.mxu0 %vm261_vm0, %v1581_v1 }
  0x87   : > { %2109 = vmatmul.mubr.msk.bf16.gmra.mrb[8].mxu1 %vm261_vm0, %v751_v33  ;;  %2191 = vmatmul.mubr.msk.bf16.vlgmr.msra.gmra.mrb[0].mxu0 %vm261_vm0, %v1582_v18 }
  0x88   : > { %2112 = vmatprep.mubr.msk.bf16.mxu1 %vm261_vm0, %v752_v24  ;;  %2194 = vmatprep.mubr.msk.bf16.mxu0 %vm261_vm0, %v1583_v25 }
  0x8f   : > { %2113 = vmatmul.mubr.msk.bf16.gmra.mrb[12].mxu1 %vm261_vm0, %v753_v38  ;;  %2195 = vmatmul.mubr.msk.bf16.gmra.mrb[4].mxu0 %vm261_vm0, %v1584_v39 }
  0x90   : > { %2126 = vmatprep.mubr.msk.bf16.mxu1 %vm261_vm0, %v917_v42  ;;  %2198 = vmatprep.mubr.msk.bf16.mxu0 %vm261_vm0, %v1585_v29 }
  0x97   : > { %2127 = vmatmul.mubr.msk.bf16.vlgmr.msra.gmra.mrb[8].mxu1 %vm261_vm0, %v918_v46  ;;  %2199 = vmatmul.mubr.msk.bf16.gmra.mrb[8].mxu0 %vm261_vm0, %v1586_v47 }
  0x98   : > { %2130 = vmatprep.mubr.msk.bf16.mxu1 %vm261_vm0, %v919_v41  ;;  %2202 = vmatprep.mubr.msk.bf16.mxu0 %vm261_vm0, %v1587_v48 }
  0x9f   : > { %2131 = vmatmul.mubr.msk.bf16.gmra.mrb[12].mxu1 %vm261_vm0, %v920_v51  ;;  %2203 = vmatmul.mubr.msk.bf16.gmra.mrb[12].mxu0 %vm261_vm0, %v1588_v52 }
 0x14a   : > { %v2102_v53 = vpop.f32.mrb[0].mxu1 }
 0x14b   : > { %v821_v54 = vpop.f32.mrb[1].mxu1  ;;  %v2208_v62 = vadd.f32 %v2102_v53, %v2817_v61 }
 0x14c   : > { %v2103_v55 = vpop.f32.mrb[2].mxu1  ;;  %v2210_v63 = vadd.f32 %v2817_v61, %v821_v54 }
 0x14d   : > { %v824_v56 = vpop.f32.mrb[3].mxu1  ;;  %v2212_v2 = vadd.f32 %v2103_v55, %v2817_v61 }
 0x14e   : > { %v2214_v5 = vadd.f32 %v2817_v61, %v824_v56 }
 0x152   : > { %v2106_v57 = vpop.f32.mrb[4].mxu1 }
 0x153   : > { %v837_v58 = vpop.f32.mrb[5].mxu1  ;;  %v2216_v12 = vadd.f32 %v2106_v57, %v2817_v61 }
 0x154   : > { %v2107_v59 = vpop.f32.mrb[6].mxu1  ;;  %v2218_v13 = vadd.f32 %v2817_v61, %v837_v58 }
 0x155   : > { %v840_v60 = vpop.f32.mrb[7].mxu1  ;;  %v2220_v15 = vadd.f32 %v2107_v59, %v2817_v61 }
 0x156   : > { %v2222_v20 = vadd.f32 %v2817_v61, %v840_v60 }
 0x15a   : > { %v2192_v0 = vpop.f32.mrb[0].mxu0 }
 0x15b   : > { %v2209_v3 = vadd.f32 %v2208_v62, %v2192_v0  ;;  %v1656_v4 = vpop.f32.mrb[1].mxu0 }
 0x15c   : > { %v2211_v6 = vadd.f32 %v2210_v63, %v1656_v4  ;;  %v2193_v7 = vpop.f32.mrb[2].mxu0 }
 0x15d   : > { %1736 = vst.msk [vmem:[%s2825_s20 + $0x10] sm:$0xff] %vm1733_vm1, %v2209_v3  ;;  %v2213_v8 = vadd.f32 %v2212_v2, %v2193_v7  ;;  %v1659_v9 = vpop.f32.mrb[3].mxu0 }
 0x15e   : > { %1734 = vst.msk [vmem:[%s2825_s20] sm:$0xff] %vm1733_vm1, %v2211_v6  ;;  %v2215_v11 = vadd.f32 %v2214_v5, %v1659_v9 }
 0x15f   : > { %1737 = vst.msk [vmem:[%s2825_s20 + $0x18] sm:$0xff] %vm1733_vm1, %v2213_v8 }
 0x160   : > { %1735 = vst.msk [vmem:[%s2825_s20 + $0x8] sm:$0xff] %vm1733_vm1, %v2215_v11 }
 0x162   : > { %v2196_v14 = vpop.f32.mrb[4].mxu0 }
 0x163   : > { %v2217_v17 = vadd.f32 %v2216_v12, %v2196_v14  ;;  %v1672_v19 = vpop.f32.mrb[5].mxu0 }
 0x164   : > { %v2219_v21 = vadd.f32 %v2218_v13, %v1672_v19  ;;  %v2197_v22 = vpop.f32.mrb[6].mxu0 }
 0x165   : > { %1740 = vst.msk [vmem:[%s2825_s20 + $0x30] sm:$0xff] %vm1733_vm1, %v2217_v17  ;;  %v2221_v23 = vadd.f32 %v2220_v15, %v2197_v22  ;;  %v1675_v26 = vpop.f32.mrb[7].mxu0 }
 0x166   : > { %1738 = vst.msk [vmem:[%s2825_s20 + $0x20] sm:$0xff] %vm1733_vm1, %v2219_v21  ;;  %v2223_v27 = vadd.f32 %v2222_v20, %v1675_v26 }
 0x167   : > { %1741 = vst.msk [vmem:[%s2825_s20 + $0x38] sm:$0xff] %vm1733_vm1, %v2221_v23 }
 0x168   : > { %1739 = vst.msk [vmem:[%s2825_s20 + $0x28] sm:$0xff] %vm1733_vm1, %v2223_v27 }
 0x16a   : > { %v2128_v10 = vpop.f32.mrb[8].mxu1  ;;  %v2200_v16 = vpop.f32.mrb[8].mxu0 }
 0x16b   : > { %v2224_v1 = vadd.f32 %v2128_v10, %v2817_v61  ;;  %v1020_v30 = vpop.f32.mrb[9].mxu1  ;;  %v1688_v32 = vpop.f32.mrb[9].mxu0 }
 0x16c   : > { %v2226_v31 = vadd.f32 %v2817_v61, %v1020_v30  ;;  %v2129_v33 = vpop.f32.mrb[10].mxu1  ;;  %v2201_v25 = vpop.f32.mrb[10].mxu0 }
 0x16d   : > { %v2225_v18 = vadd.f32 %v2224_v1, %v2200_v16  ;;  %v2228_v24 = vadd.f32 %v2129_v33, %v2817_v61  ;;  %v1023_v28 = vpop.f32.mrb[11].mxu1  ;;  %v1691_v38 = vpop.f32.mrb[11].mxu0 }
 0x16e   : > { %v2227_v34 = vadd.f32 %v2226_v31, %v1688_v32  ;;  %v2230_v35 = vadd.f32 %v2817_v61, %v1023_v28 }
 0x16f   : > { %1744 = vst.msk [vmem:[%s2825_s20 + $0x50] sm:$0xff] %vm1733_vm1, %v2225_v18  ;;  %v2229_v39 = vadd.f32 %v2228_v24, %v2201_v25 }
 0x170   : > { %1742 = vst.msk [vmem:[%s2825_s20 + $0x40] sm:$0xff] %vm1733_vm1, %v2227_v34  ;;  %v2231_v42 = vadd.f32 %v2230_v35, %v1691_v38 }
 0x171   : > { %1745 = vst.msk [vmem:[%s2825_s20 + $0x58] sm:$0xff] %vm1733_vm1, %v2229_v39 }
 0x172   : > { %1743 = vst.msk [vmem:[%s2825_s20 + $0x48] sm:$0xff] %vm1733_vm1, %v2231_v42  ;;  %v2132_v29 = vpop.f32.mrb[12].mxu1  ;;  %v2204_v37 = vpop.f32.mrb[12].mxu0 }
 0x173   : > { %v2232_v36 = vadd.f32 %v2132_v29, %v2817_v61  ;;  %v1036_v40 = vpop.f32.mrb[13].mxu1  ;;  %v1704_v44 = vpop.f32.mrb[13].mxu0 }
 0x174   : > { %v2234_v43 = vadd.f32 %v2817_v61, %v1036_v40  ;;  %v2133_v45 = vpop.f32.mrb[14].mxu1  ;;  %v2205_v47 = vpop.f32.mrb[14].mxu0 }
 0x175   : > { %v2233_v46 = vadd.f32 %v2232_v36, %v2204_v37  ;;  %v1039_v41 = vpop.f32.mrb[15].mxu1  ;;  %v1707_v50 = vpop.f32.mrb[15].mxu0 }
 0x176   : > { %v2235_v48 = vadd.f32 %v2234_v43, %v1704_v44  ;;  %v2236_v49 = vadd.f32 %v2817_v61, %v1039_v41 }
 0x177   : > { %1748 = vst.msk [vmem:[%s2825_s20 + $0x70] sm:$0xff] %vm1733_vm1, %v2233_v46 }
 0x178   : > { %1746 = vst.msk [vmem:[%s2825_s20 + $0x60] sm:$0xff] %vm1733_vm1, %v2235_v48  ;;  %v2237_v51 = vadd.f32 %v2236_v49, %v1707_v50 }
 0x17a   : > { %1747 = vst.msk [vmem:[%s2825_s20 + $0x68] sm:$0xff] %vm1733_vm1, %v2237_v51 }
 0x17b PF: > { %s13_s14 = sadd.s32 1, %s2407_s14   ;;  %s2883_s12 = smov %s2403_s13 }
 0x17c   : > { %p10_p5 = scmp.ge.s32.totalorder %s13_s14, 4   ;;  %s2884_s13 = smov %s2886_s15 }
 0x17e   :  { %12 = sbr.rel (!%p10_p5) target bundleno = 2 (0x2), region = 76 }

</bundles_post_ra>
